<compile_context>
chip_gen: v5e
topology: v5e:2x2
jax: 0.10.0
libtpu: 0.0.40
codegen_flags: <defaults>
</compile_context>

<pallas_src>
import functools
import math

import jax
import jax.numpy as jnp
from jax import lax
from jax.experimental import pallas as pl
from jax.experimental.pallas import tpu as pltpu


# ---------------------------------------------------------------------------
# hardware-aware defaults
# ---------------------------------------------------------------------------
def _vmem_capacity_bytes():
    try:
        info = pltpu.get_tpu_info()
        cap = getattr(info, "vmem_capacity_bytes", None)
        if cap:
            return int(cap)
    except Exception:
        pass
    return 64 * 1024 * 1024          # conservative (v7x-sized) fallback


_VMEM_CAP = _vmem_capacity_bytes()
_BIG_VMEM = _VMEM_CAP >= 100 * 1024 * 1024          # v5e/v6e (128 MiB) vs v7x (64 MiB)
_VMEM_LIMIT = (96 if _BIG_VMEM else 48) * 1024 * 1024


def _pick_tile(dim, target, aligns=(256, 128, 8)):
    """Largest divisor of `dim` that is <= target and a multiple of one of `aligns`
    (tried in order). Falls back to the full dim (always a legal block extent)."""
    if dim <= target:
        return dim
    for align in aligns:
        t = (target // align) * align
        while t >= align:
            if dim % t == 0:
                return t
            t -= align
    return dim


# ---------------------------------------------------------------------------
# Tiled linear:  y = x @ W + b
#   grid = (M/tm, N/tn, K/tk); K is the reduction ("arbitrary") axis with an
#   f32 VMEM accumulator; bias added once at the final K step.
# ---------------------------------------------------------------------------
def _linear_kernel(x_ref, w_ref, b_ref, o_ref, acc_ref):
    @pl.when(pl.program_id(2) == 0)
    def _init():
        acc_ref[...] = jnp.zeros_like(acc_ref)

    acc_ref[...] += jnp.dot(x_ref[...], w_ref[...],
                            preferred_element_type=jnp.float32)

    @pl.when(pl.program_id(2) == pl.num_programs(2) - 1)
    def _finalize():
        o_ref[...] = (acc_ref[...] + b_ref[...].astype(jnp.float32)).astype(o_ref.dtype)


def linear(x2d, w, b):
    M, K = x2d.shape
    K2, N = w.shape
    assert K == K2 and b.shape == (N,)
    tm = _pick_tile(M, 512 if _BIG_VMEM else 256, aligns=(256, 128, 8))
    tn = _pick_tile(N, 1024 if _BIG_VMEM else 512, aligns=(256, 128, 8))
    tk = _pick_tile(K, 512, aligns=(256, 128, 8))
    b2d = b.reshape(1, N)
    itemsize = jnp.dtype(x2d.dtype).itemsize
    return pl.pallas_call(
        _linear_kernel,
        out_shape=jax.ShapeDtypeStruct((M, N), x2d.dtype),
        grid_spec=pltpu.PrefetchScalarGridSpec(
            num_scalar_prefetch=0,
            grid=(M // tm, N // tn, K // tk),
            in_specs=[pl.BlockSpec((tm, tk), lambda i, j, k: (i, k)),
                      pl.BlockSpec((tk, tn), lambda i, j, k: (k, j)),
                      pl.BlockSpec((1, tn), lambda i, j, k: (0, j))],
            out_specs=pl.BlockSpec((tm, tn), lambda i, j, k: (i, j)),
            scratch_shapes=[pltpu.VMEM((tm, tn), jnp.float32)]),
        compiler_params=pltpu.CompilerParams(
            dimension_semantics=("parallel", "parallel", "arbitrary"),
            vmem_limit_bytes=_VMEM_LIMIT),
        cost_estimate=pl.CostEstimate(
            flops=2 * M * N * K,
            transcendentals=0,
            bytes_accessed=itemsize * (M * K + K * N + M * N + N)),
    )(x2d, w, b2d)


# ---------------------------------------------------------------------------
# Flash attention with in-kernel causal mask + ALiBi bias.
#   layout: one fused qkv tensor of shape (3, B, H, T, head_dim).
#   grid = (B, H, T/tq, T/tk); kj (KV blocks) is the innermost "arbitrary" axis.
#   m / l / acc live in VMEM scratch across kj; init at kj==0, finalize at last kj.
# ---------------------------------------------------------------------------
def _flash_attn_kernel(slopes_ref, q_ref, k_ref, v_ref, o_ref,
                       m_sc, l_sc, acc_sc, *, tq, tk):
    h = pl.program_id(1)
    qi = pl.program_id(2)
    kj = pl.program_id(3)
    n_kv = pl.num_programs(3)

    @pl.when(kj == 0)
    def _init():
        m_sc[...] = jnp.full_like(m_sc, -jnp.inf)
        l_sc[...] = jnp.zeros_like(l_sc)
        acc_sc[...] = jnp.zeros_like(acc_sc)

    # Causal block skip: the whole KV block is in the future of every query row
    # of this Q block iff kj*tk > qi*tq + tq - 1.  (The K/V DMA for these steps
    # is already elided by the clamped index_map in attention_core.)
    @pl.when(kj * tk <= qi * tq + (tq - 1))
    def _compute():
        q = q_ref[0, 0, 0]          # (tq, hd)  -- 1/sqrt(hd) folded into W_q
        k = k_ref[0, 0, 0]          # (tk, hd)
        v = v_ref[0, 0, 0]          # (tk, hd)

        # QK^T: contract trailing dims of both operands (no explicit transpose).
        s = lax.dot_general(q, k, (((1,), (1,)), ((), ())),
                            preferred_element_type=jnp.float32)    # (tq, tk)

        # Causal mask / ALiBi generated from iota (no (T,T) HBM tables).
        q_pos = qi * tq + lax.broadcasted_iota(jnp.int32, (tq, tk), 0)
        k_pos = kj * tk + lax.broadcasted_iota(jnp.int32, (tq, tk), 1)
        rel = (k_pos - q_pos).astype(jnp.float32)
        s = s + slopes_ref[h] * rel                                # per-head slope (SMEM)
        # Large finite negative -> exp underflows to exactly 0.  NOTE: a fully
        # masked row (can only happen if a processed block were entirely future,
        # which the kj=0 block never is) is still correct only because its bogus
        # contribution gets rescaled to 0 by alpha later -- keep that rescale.
        s = jnp.where(q_pos >= k_pos, s, -1e30)

        m_prev = m_sc[...]
        m_new = jnp.maximum(m_prev, jnp.max(s, axis=-1, keepdims=True))
        alpha = jnp.exp(m_prev - m_new)
        p = jnp.exp(s - m_new)
        l_sc[...] = alpha * l_sc[...] + jnp.sum(p, axis=-1, keepdims=True)
        pv = lax.dot_general(p.astype(v.dtype), v, (((1,), (0,)), ((), ())),
                             preferred_element_type=jnp.float32)
        acc_sc[...] = alpha * acc_sc[...] + pv
        m_sc[...] = m_new

    @pl.when(kj == n_kv - 1)
    def _finalize():
        inv_l = pl.reciprocal(l_sc[...], approx=True)     # EUP slot, ~free
        o_ref[0, 0] = (acc_sc[...] * inv_l).astype(o_ref.dtype)   # dense block store


def attention_core(qkvh, slopes, n_head, tq=None, tk=None):
    three, B, H, T, hd = qkvh.shape
    assert three == 3 and H == n_head
    if tq is None:
        tq = _pick_tile(T, 256 if _BIG_VMEM else 128, aligns=(128, 8))
    if tk is None:
        tk = _pick_tile(T, 512 if _BIG_VMEM else 256, aligns=(128, 8))
    n_q, n_kv = T // tq, T // tk

    kernel = functools.partial(_flash_attn_kernel, tq=tq, tk=tk)

    # index_maps get (grid..., *prefetch_refs).  K/V clamp kj to the causal
    # boundary block so DMAs for purely-future blocks are elided (same index).
    def q_map(b, h, qi, kj, s):
        return (0, b, h, qi, 0)

    def k_map(b, h, qi, kj, s):
        return (1, b, h, jnp.minimum(kj, (qi * tq + tq - 1) // tk), 0)

    def v_map(b, h, qi, kj, s):
        return (2, b, h, jnp.minimum(kj, (qi * tq + tq - 1) // tk), 0)

    itemsize = jnp.dtype(qkvh.dtype).itemsize
    return pl.pallas_call(
        kernel,
        out_shape=jax.ShapeDtypeStruct((B, H, T, hd), qkvh.dtype),
        grid_spec=pltpu.PrefetchScalarGridSpec(
            num_scalar_prefetch=1,                       # ALiBi slopes -> SMEM
            grid=(B, H, n_q, n_kv),
            in_specs=[pl.BlockSpec((1, 1, 1, tq, hd), q_map),
                      pl.BlockSpec((1, 1, 1, tk, hd), k_map),
                      pl.BlockSpec((1, 1, 1, tk, hd), v_map)],
            out_specs=pl.BlockSpec((1, 1, tq, hd),
                                   lambda b, h, qi, kj, s: (b, h, qi, 0)),
            scratch_shapes=[pltpu.VMEM((tq, 1), jnp.float32),      # m
                            pltpu.VMEM((tq, 1), jnp.float32),      # l
                            pltpu.VMEM((tq, hd), jnp.float32)]),   # acc
        compiler_params=pltpu.CompilerParams(
            dimension_semantics=("parallel", "parallel", "parallel", "arbitrary"),
            vmem_limit_bytes=_VMEM_LIMIT),
        cost_estimate=pl.CostEstimate(
            flops=4 * B * H * T * T * hd,                 # QK^T + PV
            transcendentals=B * H * T * T,                # exp
            bytes_accessed=itemsize * 4 * B * H * T * hd),
    )(slopes, qkvh, qkvh, qkvh)


# ---------------------------------------------------------------------------
# Parameter prep (done ONCE, not per forward): fused QKV weight/bias with the
# 1/sqrt(head_dim) softmax scale folded into the Q columns; flat ALiBi slopes.
# ---------------------------------------------------------------------------
def prepare_params(params, n_head, dtype=jnp.float32):
    C = params["wq"].shape[0]
    hd = C // n_head
    scale = 1.0 / math.sqrt(hd)
    w_qkv = jnp.concatenate([params["wq"] * scale, params["wkv"]], axis=1).astype(dtype)
    b_qkv = jnp.concatenate([params["bq"] * scale, params["bkv"]], axis=0).astype(dtype)
    return {
        "w_qkv": w_qkv,                                   # (C, 3C)
        "b_qkv": b_qkv,                                   # (3C,)
        "wproj": params["wproj"].astype(dtype),
        "bproj": params["bproj"].astype(dtype),
        "slopes": params["alibi_m"].reshape(n_head).astype(jnp.float32),
    }


# ---------------------------------------------------------------------------
# CausalAttention forward (no-cache path; dropout = 0.0 -> identity)
# ---------------------------------------------------------------------------
def causal_attention(prep, x, n_head, tq=None, tk=None):
    B, T, C = x.shape
    hd = C // n_head

    # Fused QKV projection: one (C, 3C) matmul reads x from HBM once.
    qkv = linear(x.reshape(B * T, C), prep["w_qkv"], prep["b_qkv"])     # (B*T, 3C)

    # Split q/k/v + heads with a single layout transpose: (B*T,3C)->(3,B,H,T,hd).
    # The attention kernel then consumes one fused tensor; q/k/v selection is
    # done by the BlockSpec index_maps (no per-tensor slice copies).
    qkvh = qkv.reshape(B, T, 3, n_head, hd).transpose(2, 0, 3, 1, 4)

    y = attention_core(qkvh, prep["slopes"], n_head, tq=tq, tk=tk)      # (B, H, T, hd)

    # merge heads back and project
    y = y.transpose(0, 2, 1, 3).reshape(B * T, C)
    y = linear(y, prep["wproj"], prep["bproj"]).reshape(B, T, C)
    # TODO(synk): attn/resid dropout omitted (config.dropout == 0.0 -> identity in eval).
    # TODO(synk): use_cache incremental-decode (KV-cache concat) path not implemented.
    return y


# ---------------------------------------------------------------------------
# Plain-JAX reference (uses the actual alibi_offset / c_mask tables)
# ---------------------------------------------------------------------------
def causal_attention_ref(params, x, n_head):
    B, T, C = x.shape
    hd = C // n_head
    q = x @ params["wq"] + params["bq"]
    kv = x @ params["wkv"] + params["bkv"]
    k, v = kv[..., :C], kv[..., C:]
    q = q.reshape(B, T, n_head, hd).transpose(0, 2, 1, 3)
    k = k.reshape(B, T, n_head, hd).transpose(0, 2, 1, 3)
    v = v.reshape(B, T, n_head, hd).transpose(0, 2, 1, 3)
    att = jnp.einsum("bhqd,bhkd->bhqk", q, k) / math.sqrt(hd)
    att = att + params["alibi_m"][None] * params["alibi_offset"][:T, :T]
    att = jnp.where(params["c_mask"][:, :, :T, :T] == 0, -jnp.inf, att)
    att = jax.nn.softmax(att, axis=-1)
    y = jnp.einsum("bhqk,bhkd->bhqd", att, v)
    y = y.transpose(0, 2, 1, 3).reshape(B, T, C)
    return y @ params["wproj"] + params["bproj"]


# ---------------------------------------------------------------------------
# Main
# ---------------------------------------------------------------------------
if __name__ == "__main__":
    def make_params(key, C, n_head, block_size):
        ks = jax.random.split(key, 6)
        init = lambda k, shape: 0.02 * jax.random.normal(k, shape, jnp.float32)
        p = {
            "wq":    init(ks[0], (C, C)),
            "bq":    init(ks[1], (C,)),
            "wkv":   init(ks[2], (C, 2 * C)),
            "bkv":   init(ks[3], (2 * C,)),
            "wproj": init(ks[4], (C, C)),
            "bproj": init(ks[5], (C,)),
        }
        p["alibi_m"] = jnp.array(
            [2.0 ** (-8.0 * (h + 1) / n_head) for h in range(n_head)],
            jnp.float32).reshape(n_head, 1, 1)
        idx = jnp.arange(block_size)
        p["alibi_offset"] = (idx[None, :] - idx[:, None]).astype(jnp.float32)
        p["c_mask"] = jnp.tril(jnp.ones((block_size, block_size), jnp.float32)
                               ).reshape(1, 1, block_size, block_size)
        return p

    key = jax.random.PRNGKey(0)

    # --- test 1: small module-consistent shapes, f32 -----------------------
    B, T, C, n_head = 2, 8, 32, 4
    k_p, k_x, key = jax.random.split(key, 3)
    params = make_params(k_p, C, n_head, block_size=16)
    x = jax.random.normal(k_x, (B, T, C), jnp.float32)
    prep = prepare_params(params, n_head, dtype=jnp.float32)
    y = jax.block_until_ready(causal_attention(prep, x, n_head))
    y_ref = causal_attention_ref(params, x, n_head)
    if not jnp.allclose(y, y_ref, rtol=5e-3, atol=5e-3):
        raise AssertionError("Pallas f32 output mismatch (small shapes)")

    # --- test 2: tiled shapes, tq != tk -> exercises causal block-skip/clamp
    B2, T2, C2, H2 = 2, 256, 128, 2
    k_p2, k_x2, key = jax.random.split(key, 3)
    params2 = make_params(k_p2, C2, H2, block_size=T2)
    x2 = jax.random.normal(k_x2, (B2, T2, C2), jnp.float32)
    prep2 = prepare_params(params2, H2, dtype=jnp.float32)
    y2 = jax.block_until_ready(causal_attention(prep2, x2, H2, tq=64, tk=128))
    y2_ref = causal_attention_ref(params2, x2, H2)
    if not jnp.allclose(y2, y2_ref, rtol=5e-3, atol=5e-3):
        raise AssertionError("Pallas f32 output mismatch (tiled shapes, tq != tk)")

    # --- test 3: bf16 activations/weights (f32 accumulation), same tiling --
    prep2_bf16 = prepare_params(params2, H2, dtype=jnp.bfloat16)
    y3 = jax.block_until_ready(
        causal_attention(prep2_bf16, x2.astype(jnp.bfloat16), H2, tq=64, tk=128))
    if not jnp.allclose(y3.astype(jnp.float32), y2_ref, rtol=5e-2, atol=2e-2):
        raise AssertionError("Pallas bf16 output mismatch (tiled shapes)")

    print("KERNEL_OK")
</pallas_src>

<mosaic_0001>
module attributes {stable_mosaic.version = 11 : i64} {
  func.func @_linear_kernel(%arg0: i32, %arg1: i32, %arg2: i32, %arg3: memref<16x32xf32, #tpu.memory_space<vmem>>, %arg4: memref<32x96xf32, #tpu.memory_space<vmem>>, %arg5: memref<1x96xf32, #tpu.memory_space<vmem>>, %arg6: memref<16x96xf32, #tpu.memory_space<vmem>>, %arg7: memref<16x96xf32, #tpu.memory_space<vmem>>) attributes {dimension_semantics = [#tpu.dimension_semantics<parallel>, #tpu.dimension_semantics<parallel>, #tpu.dimension_semantics<arbitrary>], iteration_bounds = array<i64: 1, 1, 1>, scalar_prefetch = 0 : i64, scratch_operands = 1 : i64, tpu.core_type = #tpu.core_type<tc>, window_params = [{transform_indices = @transform_0, window_bounds = array<i64: 16, 32>}, {transform_indices = @transform_1, window_bounds = array<i64: 32, 96>}, {transform_indices = @transform_2, window_bounds = array<i64: 1, 96>}, {transform_indices = @transform_3, window_bounds = array<i64: 16, 96>}]} {
    %c0_i32 = arith.constant 0 : i32
    %0 = arith.cmpi eq, %arg2, %c0_i32 : i32
    %1 = arith.extui %0 : i1 to i32
    %c0_i32_0 = arith.constant 0 : i32
    %2 = arith.cmpi ne, %1, %c0_i32_0 : i32
    scf.if %2 {
      %cst_10 = arith.constant 0.000000e+00 : f32
      %12 = vector.broadcast %cst_10 : f32 to vector<16x96xf32>
      %c0_11 = arith.constant 0 : index
      %c0_12 = arith.constant 0 : index
      %13 = vector.load %arg7[%c0_11, %c0_12] : memref<16x96xf32, #tpu.memory_space<vmem>>, vector<16x96xf32>
      tpu.vector_store %arg7[%c0_11, %c0_12], %12 {strides = array<i32>} : memref<16x96xf32, #tpu.memory_space<vmem>>, vector<16x96xf32>,
    } else {
    }
    %c0 = arith.constant 0 : index
    %c0_1 = arith.constant 0 : index
    %3 = vector.load %arg7[%c0, %c0_1] : memref<16x96xf32, #tpu.memory_space<vmem>>, vector<16x96xf32>
    %c0_2 = arith.constant 0 : index
    %c0_3 = arith.constant 0 : index
    %4 = vector.load %arg3[%c0_2, %c0_3] : memref<16x32xf32, #tpu.memory_space<vmem>>, vector<16x32xf32>
    %c0_4 = arith.constant 0 : index
    %c0_5 = arith.constant 0 : index
    %5 = vector.load %arg4[%c0_4, %c0_5] : memref<32x96xf32, #tpu.memory_space<vmem>>, vector<32x96xf32>
    %cst = arith.constant dense<0.000000e+00> : vector<16x96xf32>
    %6 = tpu.matmul %4, %5, %cst {dimension_numbers = #tpu.dot_dimension_numbers<[1], [0], [0], [1], [0, 0, 1, 1], [], []>} : vector<16x32xf32>, vector<32x96xf32>, vector<16x96xf32> -> vector<16x96xf32>
    %7 = arith.addf %3, %6 : vector<16x96xf32>
    %c0_6 = arith.constant 0 : index
    %c0_7 = arith.constant 0 : index
    %8 = vector.load %arg7[%c0_6, %c0_7] : memref<16x96xf32, #tpu.memory_space<vmem>>, vector<16x96xf32>
    tpu.vector_store %arg7[%c0_6, %c0_7], %7 {strides = array<i32>} : memref<16x96xf32, #tpu.memory_space<vmem>>, vector<16x96xf32>,
    %c0_i32_8 = arith.constant 0 : i32
    %9 = arith.cmpi eq, %arg2, %c0_i32_8 : i32
    %10 = arith.extui %9 : i1 to i32
    %c0_i32_9 = arith.constant 0 : i32
    %11 = arith.cmpi ne, %10, %c0_i32_9 : i32
    scf.if %11 {
      %c0_10 = arith.constant 0 : index
      %c0_11 = arith.constant 0 : index
      %12 = vector.load %arg7[%c0_10, %c0_11] : memref<16x96xf32, #tpu.memory_space<vmem>>, vector<16x96xf32>
      %c0_12 = arith.constant 0 : index
      %c0_13 = arith.constant 0 : index
      %13 = vector.load %arg5[%c0_12, %c0_13] : memref<1x96xf32, #tpu.memory_space<vmem>>, vector<1x96xf32>
      %14 = vector.broadcast %13 : vector<1x96xf32> to vector<16x96xf32>
      %15 = arith.addf %12, %14 : vector<16x96xf32>
      %c0_14 = arith.constant 0 : index
      %c0_15 = arith.constant 0 : index
      %16 = vector.load %arg6[%c0_14, %c0_15] : memref<16x96xf32, #tpu.memory_space<vmem>>, vector<16x96xf32>
      tpu.vector_store %arg6[%c0_14, %c0_15], %15 {strides = array<i32>} : memref<16x96xf32, #tpu.memory_space<vmem>>, vector<16x96xf32>,
    } else {
    }
    return
  }
  func.func @transform_0(%arg0: i32, %arg1: i32, %arg2: i32) -> (i32, i32) {
    %c0_i32 = arith.constant 0 : i32
    return %arg0, %arg2 : i32, i32
  }
  func.func @transform_1(%arg0: i32, %arg1: i32, %arg2: i32) -> (i32, i32) {
    %c0_i32 = arith.constant 0 : i32
    return %arg2, %arg1 : i32, i32
  }
  func.func @transform_2(%arg0: i32, %arg1: i32, %arg2: i32) -> (i32, i32) {
    %c0_i32 = arith.constant 0 : i32
    %c0_i32_0 = arith.constant 0 : i32
    return %c0_i32, %arg1 : i32, i32
  }
  func.func @transform_3(%arg0: i32, %arg1: i32, %arg2: i32) -> (i32, i32) {
    %c0_i32 = arith.constant 0 : i32
    return %arg0, %arg1 : i32, i32
  }
}

</mosaic_0001>

<bundles_post_ra>
// kernel: tpu_custom_call.1
= control target key start
LH: loop header
LB: loop body
LE: loop exit
PB: predicated region body
PF: predicated region fallthrough
CT: control target
= control target key end

     0   :  { %8 = vsyncpa [#allocation4], 0  ;;  %s274_s0 = inlined_call_operand.hbm [shape: f32[16,32], index: 0, kind: input, shape index: {}]   ;;  %s275_s1 = inlined_call_operand.hbm [shape: f32[32,96], index: 1, kind: input, shape index: {}]   ;;  %s276_s2 = inlined_call_operand.vmem [shape: f32[1,96], index: 2, kind: input, shape index: {}]   ;;  %s277_s3 = inlined_call_operand.hbm [shape: f32[16,96], index: 3, kind: output, shape index: {}]  }
   0x1   :  { %9 = vsyncpa [#allocation7], 0 }
   0x2   :  { %10 = vsyncpa [#allocation5], 0  ;;  %s15_s14 = sshll.u32 %s274_s0, 4  ;;  %s221_s15 = smov [#allocation3]   ;;  %s16_s14 = int_to_ptr.hbm [resolvable:$true] %s15_s14 }
   0x3   :  { %s17_s16 = sshll.u32 %s221_s15, 4  ;;  %s28_s19 = sshll.u32 %s275_s1, 4  ;;  %s18_s16 = int_to_ptr.vmem [resolvable:$true] %s17_s16  ;;  %s29_s19 = int_to_ptr.hbm [resolvable:$true] %s28_s19 }
   0x4   :  { %s222_s20 = smov 128   ;;  %s223_s21 = smov 8  }
   0x5   :  { %23 = dma.hbm_to_vmem [thread:$0]  %s16_s14, 256, %s18_s16, [#allocation4], %s222_s20, %s222_s20, %s223_s21  }
   0x6   :  { %s224_s22 = smov [#allocation6]  }
   0x7   :  { %s30_s23 = sshll.u32 %s224_s22, 4  ;;  %s31_s23 = int_to_ptr.vmem [resolvable:$true] %s30_s23 }
   0x8   :  { %36 = dma.hbm_to_vmem [thread:$0]  %s29_s19, 512, %s31_s23, [#allocation7], %s222_s20, %s222_s20, %s223_s21  }
   0x9   :  { %215 = dma.done.wait [#allocation4], 256  }
   0xa   :  { %216 = vsyncadd [#allocation4], 4294967040 }
   0xb   :  { %217 = dma.done.wait [#allocation7], 512  }
   0xc   :  { %218 = vsyncadd [#allocation7], 4294966784  ;;  %vm51_vm0 = vcmask 785408   ;;  %v225_v0 = vmov 0.0   ;;  %v61_v1 = vld [vmem:[#allocation6 + $0x18] sm:$0xff]  ;;  %v60_v2 = vld [vmem:[#allocation6 + $0x10] sm:$0xff] }
   0xd   :  { %52 = vst.msk [vmem:[#allocation2] sm:$0xff] %vm51_vm0, %v225_v0  ;;  %81 = vmatpush.msra.mxu0 %v61_v1  ;;  %132 = vmatpush.msra.mxu1 %v61_v1  ;;  %v59_v3 = vld [vmem:[#allocation6 + $0x8] sm:$0xff]  ;;  %v58_v4 = vld [vmem:[#allocation6] sm:$0xff]  ;;  %v56_v5 = vld [vmem:[#allocation3] sm:$0xff]  ;;  %vm62_vm1 = vcmask 261120   ;;  %s226_s24 = smov [#allocation8]  }
   0xe   :  { %53 = vst.msk [vmem:[#allocation2 + $0x8] sm:$0xff] %vm51_vm0, %v225_v0  ;;  %v57_v6 = vld [vmem:[#allocation3 + $0x8] sm:$0xff]  ;;  %v142_v13 = vld [vmem:[%s276_s2] ss:$0 sm:$0xff]  ;;  %s114_s25 = sshll.u32 %s226_s24, 4  ;;  %s116_s28 = sshll.u32 %s277_s3, 4  ;;  %s115_s25 = int_to_ptr.vmem [resolvable:$true] %s114_s25  ;;  %s117_s28 = int_to_ptr.hbm [resolvable:$true] %s116_s28 }
   0xf   :  { %82 = vmatpush.msra.mxu0 %v60_v2  ;;  %133 = vmatpush.msra.mxu1 %v60_v2 }
  0x11   :  { %83 = vmatpush.msra.mxu0 %v59_v3  ;;  %134 = vmatpush.msra.mxu1 %v59_v3 }
  0x13   :  { %84 = vmatpush.msra.mxu0 %v58_v4  ;;  %135 = vmatpush.msra.mxu1 %v58_v4 }
  0x14   :  { %130 = vmatmul.msk.f32.vlgmr.msra.gmra.mxu0 %vm62_vm1, %v56_v5  ;;  %131 = vmatmul.msk.f32.vlgmr.msra.gmra.mxu1 %vm62_vm1, %v57_v6  ;;  %v54_v7 = vld [vmem:[#allocation2] sm:$0xff] }
  0x15   :  { %v55_v8 = vld [vmem:[#allocation2 + $0x8] sm:$0xff] }
  0x91   :  { %v86_v9 = vpop.f32.mrf.mxu0  ;;  %v89_v10 = vpop.f32.mrf.mxu1 }
  0x92   :  { %v92_v11 = vadd.f32 %v86_v9, %v54_v7  ;;  %v93_v12 = vadd.f32 %v89_v10, %v55_v8 }
  0x94   :  { %95 = vst.msk [vmem:[#allocation2] sm:$0xff] %vm51_vm0, %v92_v11 }
  0x95   :  { %96 = vst.msk [vmem:[#allocation2 + $0x8] sm:$0xff] %vm51_vm0, %v93_v12 }
  0x9b   :  { %v100_v14 = vld [vmem:[#allocation2] sm:$0xff] }
  0x9c   :  { %v101_v15 = vld [vmem:[#allocation2 + $0x8] sm:$0xff]  ;;  %v106_v16 = vadd.f32 %v142_v13, %v100_v14 }
  0x9d   :  { %v107_v17 = vadd.f32 %v142_v13, %v101_v15 }
  0x9e   :  { %108 = vst.msk [vmem:[#allocation8] sm:$0xff] %vm51_vm0, %v106_v16 }
  0x9f   :  { %109 = vst.msk [vmem:[#allocation8 + $0x8] sm:$0xff] %vm51_vm0, %v107_v17 }
  0xa0   :  { %122 = dma.vmem_to_hbm [thread:$0]  %s115_s25, 256, %s117_s28, [#allocation5], %s222_s20, %s222_s20, %s223_s21  }
  0xa1   :  { %219 = dma.done.wait [#allocation5], 256  }
  0xa2   :  { %220 = vsyncadd [#allocation5], 4294967040 }
  0xa3   :  { %127 = vsyncpa [#allocation4], 1 }
  0xa4   :  { %128 = vsyncpa [#allocation7], 1 }
  0xa5   :  { %129 = vsyncpa [#allocation5], 1 }

</bundles_post_ra>
